<compile_context>
chip_gen: v7x
topology: tpu7x:2x2x1
jax: 0.10.0
libtpu: 0.0.40
codegen_flags: <defaults>
</compile_context>

<pallas_src>
import functools
import math

import jax
import jax.numpy as jnp
from jax import lax
from jax.experimental import pallas as pl
from jax.experimental.pallas import tpu as pltpu

_MIB = 1 << 20


# ---------------------------------------------------------------------------
# Kernels
# ---------------------------------------------------------------------------

def _excite(pooled, w1, w2):
    """fc1 -> ReLU -> fc2 -> sigmoid on a (n, C) pooled tile (f32 accumulate).

    Weights stay in torch Linear layout: w1 (hidden, C), w2 (C, hidden); the
    dot_general dimension_numbers contract the 'in' axes directly so no
    transposes are emitted, and operands keep their native dtype (bf16 stays
    bf16 on the MXU) with f32 accumulation.
    """
    h = lax.dot_general(pooled.astype(w1.dtype), w1, (((1,), (1,)), ((), ())),
                        preferred_element_type=jnp.float32)            # (n, hidden)
    h = jnp.maximum(h, 0.0)
    s = lax.dot_general(h.astype(w2.dtype), w2, (((1,), (1,)), ((), ())),
                        preferred_element_type=jnp.float32)            # (n, C)
    return jax.nn.sigmoid(s)


def _se_kernel_batched(x_ref, w1_ref, w2_ref, o_ref, *, inv_hw):
    """3-D batch-tiled kernel: x_ref/o_ref (bt, C, HWp)."""
    x = x_ref[...]                                                      # input dtype
    # Spatial mean with f32 accumulation; no materialized f32 copy of the block.
    pooled = jnp.sum(x, axis=-1, dtype=jnp.float32) * inv_hw            # (bt, C)
    s = _excite(pooled, w1_ref[...], w2_ref[...])                       # (bt, C) f32
    o_ref[...] = x * s.astype(x.dtype)[:, :, None]


def _se_kernel_packed(x_ref, w1b_ref, w2b_ref, o_ref, *, inv_hw):
    """Sublane-packed kernel for small C: x_ref/o_ref (groups*C, HWp).

    w1b/w2b are block-diagonal kron(I_groups, w) weights so the grouped
    excitation is two plain matmuls on column vectors (no reshapes, no
    per-group loops).
    """
    x = x_ref[...]                                                      # (rows, HWp)
    pooled = jnp.sum(x, axis=-1, keepdims=True, dtype=jnp.float32) * inv_hw  # (rows, 1)
    w1b = w1b_ref[...]                                  # (groups*hidden, rows)
    w2b = w2b_ref[...]                                  # (rows, groups*hidden)
    h = jnp.dot(w1b, pooled.astype(w1b.dtype), preferred_element_type=jnp.float32)
    h = jnp.maximum(h, 0.0)
    s = jnp.dot(w2b, h.astype(w2b.dtype), preferred_element_type=jnp.float32)
    s = jax.nn.sigmoid(s)                                               # (rows, 1)
    o_ref[...] = x * s.astype(x.dtype)


def _pool_kernel(x_ref, o_ref, acc_ref, *, inv_hw):
    """Fallback pass 1: accumulate spatial sums over HW tiles."""
    @pl.when(pl.program_id(1) == 0)
    def _init():
        acc_ref[...] = jnp.zeros_like(acc_ref)

    acc_ref[...] += jnp.sum(x_ref[...], axis=-1, dtype=jnp.float32)
    o_ref[...] = acc_ref[...] * inv_hw


def _scale_kernel(pooled_ref, w1_ref, w2_ref, x_ref, o_ref):
    """Fallback pass 2: recompute the tiny excitation per tile and scale x."""
    s = _excite(pooled_ref[...], w1_ref[...], w2_ref[...])              # (bt, C) f32
    x = x_ref[...]
    o_ref[...] = x * s.astype(x.dtype)[:, :, None]


# ---------------------------------------------------------------------------
# Wrapper
# ---------------------------------------------------------------------------

def _vmem_caps():
    """(block-size budget, physical VMEM bytes) — generation aware."""
    cap = 64 * _MIB                                   # conservative fallback (v7x per-TC)
    try:
        cap = int(pltpu.get_tpu_info().vmem_capacity_bytes)
    except Exception:
        pass
    # ~64 MiB block budget on 128 MiB parts (v5e/v6e), ~24 MiB on 64 MiB v7x.
    budget = max(16 * _MIB, (cap * 5) // 8 - 16 * _MIB)
    return budget, cap


def _footprint(rows, lanes, itemsize, weight_bytes):
    """Conservative VMEM bytes for one grid step (double-buffered I/O + weights)."""
    block = rows * lanes * itemsize
    return 4 * block + 4 * weight_bytes + 4 * rows * 4 + 8192


def _vmem_limit(fp, rows, lanes, itemsize, cap):
    extra = 4 * _MIB
    if itemsize < 4:
        extra += rows * lanes * 4   # headroom for an f32 reduce temp on narrow dtypes
    return int(min(cap - _MIB, max(16 * _MIB, fp + extra)))


def se_layer(x, w1, w2, *, vmem_block_budget_bytes=None, force_split=False,
             max_packed_groups=64):
    """SELayer forward. x: (B, C, H, W); w1: (hidden, C); w2: (C, hidden)."""
    B, C, H, W = x.shape
    HW = H * W
    hidden = w1.shape[0]
    itemsize = x.dtype.itemsize
    w_itemsize = w1.dtype.itemsize
    w_bytes = (w1.size + w2.size) * w_itemsize
    inv_hw = 1.0 / float(HW)

    budget, cap = _vmem_caps()
    if vmem_block_budget_bytes is not None:
        budget = int(vmem_block_budget_bytes)

    # Lane-dense spatial axis: pad HW up to a multiple of 128 so stores are
    # unmasked vst (the mean divides by the true HW, so zero padding is exact).
    HWp = -(-HW // 128) * 128
    x3 = x.reshape(B, C, HW)
    if HWp != HW:
        x3 = jnp.pad(x3, ((0, 0), (0, 0), (0, HWp - HW)))

    def fits(rows, lanes, extra_w=0):
        return _footprint(rows, lanes, itemsize, w_bytes + extra_w) <= budget

    out3 = None

    # ---- Path 1: sublane-packed (B*C, HWp) blocks for small C --------------
    min_sub = 8 if itemsize >= 4 else (16 if itemsize == 2 else 32)
    if (not force_split) and C < min_sub and B >= 2:
        step = min_sub // math.gcd(C, min_sub)   # smallest group count w/ aligned rows
        gpb = 0
        for cand in range(step, min(B // 2, max_packed_groups) + 1, step):
            cand_wblk = 2 * cand * cand * hidden * C * w_itemsize
            if B % cand == 0 and fits(cand * C, HWp, extra_w=cand_wblk):
                gpb = cand
        if gpb:
            rows = gpb * C
            eye = jnp.eye(gpb, dtype=w1.dtype)
            w1b = jnp.kron(eye, w1)              # (gpb*hidden, gpb*C) block-diagonal
            w2b = jnp.kron(eye, w2)              # (gpb*C, gpb*hidden)
            wblk_bytes = 2 * gpb * gpb * hidden * C * w_itemsize
            fp = _footprint(rows, HWp, itemsize, wblk_bytes)
            x2 = x3.reshape(B * C, HWp)
            out2 = pl.pallas_call(
                functools.partial(_se_kernel_packed, inv_hw=inv_hw),
                out_shape=jax.ShapeDtypeStruct((B * C, HWp), x.dtype),
                grid_spec=pltpu.PrefetchScalarGridSpec(
                    num_scalar_prefetch=0,
                    grid=(B // gpb,),
                    in_specs=[
                        pl.BlockSpec((rows, HWp), lambda b: (b, 0)),
                        pl.BlockSpec(w1b.shape, lambda b: (0, 0)),
                        pl.BlockSpec(w2b.shape, lambda b: (0, 0)),
                    ],
                    out_specs=pl.BlockSpec((rows, HWp), lambda b: (b, 0)),
                ),
                compiler_params=pltpu.CompilerParams(
                    dimension_semantics=("parallel",),
                    vmem_limit_bytes=_vmem_limit(fp, rows, HWp, itemsize, cap),
                ),
            )(x2, w1b, w2b)
            out3 = out2.reshape(B, C, HWp)

    # ---- Path 2: 3-D (bt, C, HWp) batch-tiled blocks ------------------------
    if out3 is None and (not force_split) and fits(C, HWp):
        bt_cap = B // 2 if B >= 2 else B          # grid >= 2 when B >= 2 (v7x: both TCs)
        bt = 1
        for cand in range(1, max(bt_cap, 1) + 1):
            if B % cand == 0 and fits(cand * C, HWp):
                bt = cand
        fp = _footprint(bt * C, HWp, itemsize, w_bytes)
        out3 = pl.pallas_call(
            functools.partial(_se_kernel_batched, inv_hw=inv_hw),
            out_shape=jax.ShapeDtypeStruct((B, C, HWp), x.dtype),
            grid_spec=pltpu.PrefetchScalarGridSpec(
                num_scalar_prefetch=0,
                grid=(B // bt,),
                in_specs=[
                    pl.BlockSpec((bt, C, HWp), lambda b: (b, 0, 0)),
                    pl.BlockSpec((hidden, C), lambda b: (0, 0)),
                    pl.BlockSpec((C, hidden), lambda b: (0, 0)),
                ],
                out_specs=pl.BlockSpec((bt, C, HWp), lambda b: (b, 0, 0)),
            ),
            compiler_params=pltpu.CompilerParams(
                # TODO(synk): pltpu.CORE_PARALLEL could split the batch axis
                # across v7x's two TensorCores explicitly.
                dimension_semantics=("parallel",),
                vmem_limit_bytes=_vmem_limit(fp, bt * C, HWp, itemsize, cap),
            ),
        )(x3, w1, w2)

    # ---- Path 3: two-pass fallback (pool over HW tiles, then scale) --------
    if out3 is None:
        divisors = [d for d in range(1, B + 1) if B % d == 0]
        legal = sorted({B} | {d for d in divisors if d % 8 == 0}, reverse=True)
        bt_f = None
        for d in legal:
            if fits(d * C, 128):
                bt_f = d
                break
        if bt_f is None:
            # TODO(synk): even a (min-batch, C, 128) block exceeds the budget;
            # that would additionally need channel tiling.  Use the smallest
            # legal tile with a raised VMEM limit instead.
            bt_f = legal[-1]
        hwt = 128
        for m in range(HWp // 128, 0, -1):
            cand = m * 128
            if HWp % cand == 0 and fits(bt_f * C, cand):
                hwt = cand
                break
        grid_b, n_hw = B // bt_f, HWp // hwt
        fp = _footprint(bt_f * C, hwt, itemsize, w_bytes)
        limit = _vmem_limit(fp, bt_f * C, hwt, itemsize, cap)

        pooled = pl.pallas_call(
            functools.partial(_pool_kernel, inv_hw=inv_hw),
            out_shape=jax.ShapeDtypeStruct((B, C), jnp.float32),
            grid_spec=pltpu.PrefetchScalarGridSpec(
                num_scalar_prefetch=0,
                grid=(grid_b, n_hw),
                in_specs=[pl.BlockSpec((bt_f, C, hwt), lambda b, s: (b, 0, s))],
                out_specs=pl.BlockSpec((bt_f, C), lambda b, s: (b, 0)),
                scratch_shapes=[pltpu.VMEM((bt_f, C), jnp.float32)],
            ),
            compiler_params=pltpu.CompilerParams(
                dimension_semantics=("parallel", "arbitrary"),
                vmem_limit_bytes=limit,
            ),
        )(x3)

        out3 = pl.pallas_call(
            _scale_kernel,
            out_shape=jax.ShapeDtypeStruct((B, C, HWp), x.dtype),
            grid_spec=pltpu.PrefetchScalarGridSpec(
                num_scalar_prefetch=0,
                grid=(grid_b, n_hw),
                in_specs=[
                    pl.BlockSpec((bt_f, C), lambda b, s: (b, 0)),
                    pl.BlockSpec((hidden, C), lambda b, s: (0, 0)),
                    pl.BlockSpec((C, hidden), lambda b, s: (0, 0)),
                    pl.BlockSpec((bt_f, C, hwt), lambda b, s: (b, 0, s)),
                ],
                out_specs=pl.BlockSpec((bt_f, C, hwt), lambda b, s: (b, 0, s)),
            ),
            compiler_params=pltpu.CompilerParams(
                dimension_semantics=("parallel", "parallel"),
                vmem_limit_bytes=limit,
            ),
        )(pooled, w1, w2, x3)

    if HWp != HW:
        out3 = out3[..., :HW]
    return out3.reshape(B, C, H, W)


def se_layer_ref(x, w1, w2):
    """Pure-JAX reference mirroring the PyTorch forward."""
    pooled = jnp.mean(x, axis=(2, 3))                   # (B, C)
    h = jnp.maximum(pooled @ w1.T, 0.0)                 # (B, hidden)
    s = jax.nn.sigmoid(h @ w2.T)                        # (B, C)
    return x * s[:, :, None, None]


if __name__ == "__main__":
    # Shapes implied by the module: NCHW input, channel=4 -> reduction=2,
    # hidden = channel // reduction = 2.
    B, C, H, W = 2, 4, 16, 16
    reduction = C // 2
    hidden = C // reduction

    key = jax.random.PRNGKey(0)
    kx, k1, k2 = jax.random.split(key, 3)
    x = jax.random.normal(kx, (B, C, H, W), dtype=jnp.float32)
    # Deterministic synthetic weights (torch Linear weight shapes: (out, in)).
    w1 = jax.random.normal(k1, (hidden, C), dtype=jnp.float32) * 0.5
    w2 = jax.random.normal(k2, (C, hidden), dtype=jnp.float32) * 0.5

    ref = se_layer_ref(x, w1, w2)

    # Module-implied shape: B=2 forces the 3-D per-batch path (grid of 2).
    out = jax.block_until_ready(se_layer(x, w1, w2))
    assert out.shape == (B, C, H, W)
    assert jnp.allclose(out, ref, atol=1e-5, rtol=1e-5), "mismatch (batched path)"

    # Larger batch exercises the sublane-packed small-C path.
    B2 = 16
    x2 = jax.random.normal(kx, (B2, C, H, W), dtype=jnp.float32)
    ref2 = se_layer_ref(x2, w1, w2)
    out2 = jax.block_until_ready(se_layer(x2, w1, w2))
    assert jnp.allclose(out2, ref2, atol=1e-5, rtol=1e-5), "mismatch (packed path)"

    # Tiny forced budget exercises the two-pass (pool + scale) split fallback
    # used when a full-spatial block cannot fit VMEM (large C*H*W on v7x).
    out3 = jax.block_until_ready(
        se_layer(x, w1, w2, force_split=True, vmem_block_budget_bytes=32 * 1024))
    assert jnp.allclose(out3, ref, atol=1e-5, rtol=1e-5), "mismatch (split path)"

    print("KERNEL_OK")
</pallas_src>

<mosaic_0001>
module attributes {stable_mosaic.version = 11 : i64} {
  func.func @_se_kernel_batched(%arg0: i32, %arg1: memref<1x4x256xf32, #tpu.memory_space<vmem>>, %arg2: memref<2x4xf32, #tpu.memory_space<vmem>>, %arg3: memref<4x2xf32, #tpu.memory_space<vmem>>, %arg4: memref<1x4x256xf32, #tpu.memory_space<vmem>>) attributes {dimension_semantics = [#tpu.dimension_semantics<parallel>], iteration_bounds = array<i64: 2>, scalar_prefetch = 0 : i64, scratch_operands = 0 : i64, tpu.core_type = #tpu.core_type<tc>, window_params = [{transform_indices = @transform_0, window_bounds = array<i64: 1, 4, 256>}, {pipeline_mode = #tpu.pipeline_mode<synchronous>, transform_indices = @transform_1, window_bounds = array<i64: 2, 4>}, {pipeline_mode = #tpu.pipeline_mode<synchronous>, transform_indices = @transform_2, window_bounds = array<i64: 4, 2>}, {transform_indices = @transform_3, window_bounds = array<i64: 1, 4, 256>}]} {
    %c0 = arith.constant 0 : index
    %c0_0 = arith.constant 0 : index
    %c0_1 = arith.constant 0 : index
    %0 = vector.load %arg1[%c0, %c0_0, %c0_1] : memref<1x4x256xf32, #tpu.memory_space<vmem>>, vector<1x4x256xf32>
    %cst = arith.constant dense<0.000000e+00> : vector<1x4xf32>
    %1 = vector.multi_reduction <add>, %0, %cst [2] : vector<1x4x256xf32> to vector<1x4xf32>
    %cst_2 = arith.constant 3.906250e-03 : f32
    %2 = vector.broadcast %cst_2 : f32 to vector<1x4xf32>
    %3 = arith.mulf %1, %2 : vector<1x4xf32>
    %c0_3 = arith.constant 0 : index
    %c0_4 = arith.constant 0 : index
    %4 = vector.load %arg2[%c0_3, %c0_4] : memref<2x4xf32, #tpu.memory_space<vmem>>, vector<2x4xf32>
    %c0_5 = arith.constant 0 : index
    %c0_6 = arith.constant 0 : index
    %5 = vector.load %arg3[%c0_5, %c0_6] : memref<4x2xf32, #tpu.memory_space<vmem>>, vector<4x2xf32>
    %cst_7 = arith.constant dense<0.000000e+00> : vector<1x2xf32>
    %6 = tpu.matmul %3, %4, %cst_7 {dimension_numbers = #tpu.dot_dimension_numbers<[1], [1], [0], [0], [0, 0, 1, 0], [], []>} : vector<1x4xf32>, vector<2x4xf32>, vector<1x2xf32> -> vector<1x2xf32>
    %cst_8 = arith.constant 0.000000e+00 : f32
    %7 = vector.broadcast %cst_8 : f32 to vector<1x2xf32>
    %8 = arith.maximumf %6, %7 : vector<1x2xf32>
    %cst_9 = arith.constant dense<0.000000e+00> : vector<1x4xf32>
    %9 = tpu.matmul %8, %5, %cst_9 {dimension_numbers = #tpu.dot_dimension_numbers<[1], [1], [0], [0], [0, 0, 1, 0], [], []>} : vector<1x2xf32>, vector<4x2xf32>, vector<1x4xf32> -> vector<1x4xf32>
    %10 = arith.negf %9 : vector<1x4xf32>
    %11 = math.exp %10 : vector<1x4xf32>
    %cst_10 = arith.constant 1.000000e+00 : f32
    %12 = vector.broadcast %cst_10 : f32 to vector<1x4xf32>
    %13 = arith.addf %12, %11 : vector<1x4xf32>
    %14 = arith.divf %12, %13 : vector<1x4xf32>
    %15 = vector.shape_cast %14 : vector<1x4xf32> to vector<1x4x1xf32>
    %16 = vector.broadcast %15 : vector<1x4x1xf32> to vector<1x4x256xf32>
    %17 = arith.mulf %0, %16 : vector<1x4x256xf32>
    %c0_11 = arith.constant 0 : index
    %c0_12 = arith.constant 0 : index
    %c0_13 = arith.constant 0 : index
    %18 = vector.load %arg4[%c0_11, %c0_12, %c0_13] : memref<1x4x256xf32, #tpu.memory_space<vmem>>, vector<1x4x256xf32>
    tpu.vector_store %arg4[%c0_11, %c0_12, %c0_13], %17 {strides = array<i32>} : memref<1x4x256xf32, #tpu.memory_space<vmem>>, vector<1x4x256xf32>,
    return
  }
  func.func @transform_0(%arg0: i32) -> (i32, i32, i32) {
    %c0_i32 = arith.constant 0 : i32
    %c0_i32_0 = arith.constant 0 : i32
    %c0_i32_1 = arith.constant 0 : i32
    return %arg0, %c0_i32, %c0_i32_0 : i32, i32, i32
  }
  func.func @transform_1(%arg0: i32) -> (i32, i32) {
    %c0_i32 = arith.constant 0 : i32
    %c0_i32_0 = arith.constant 0 : i32
    %c0_i32_1 = arith.constant 0 : i32
    return %c0_i32, %c0_i32_0 : i32, i32
  }
  func.func @transform_2(%arg0: i32) -> (i32, i32) {
    %c0_i32 = arith.constant 0 : i32
    %c0_i32_0 = arith.constant 0 : i32
    %c0_i32_1 = arith.constant 0 : i32
    return %c0_i32, %c0_i32_0 : i32, i32
  }
  func.func @transform_3(%arg0: i32) -> (i32, i32, i32) {
    %c0_i32 = arith.constant 0 : i32
    %c0_i32_0 = arith.constant 0 : i32
    %c0_i32_1 = arith.constant 0 : i32
    return %arg0, %c0_i32, %c0_i32_0 : i32, i32, i32
  }
}

</mosaic_0001>

<bundles_post_ra>
// kernel: tpu_custom_call.1
= control target key start
LH: loop header
LB: loop body
LE: loop exit
PB: predicated region body
PF: predicated region fallthrough
CT: control target
= control target key end

     0   :  { %8 = vsyncpa [#allocation3], 0  ;;  %s853_s0 = inlined_call_operand.hbm [shape: f32[2,4,256], index: 0, kind: input, shape index: {}]   ;;  %s854_s1 = inlined_call_operand.vmem [shape: f32[2,4], index: 1, kind: input, shape index: {}]   ;;  %s855_s2 = inlined_call_operand.vmem [shape: f32[4,2], index: 2, kind: input, shape index: {}]   ;;  %s856_s3 = inlined_call_operand.hbm [shape: f32[2,4,256], index: 3, kind: output, shape index: {}]  }
   0x1   :  { %10 = vsyncpa [#allocation3 + $0x1], 0 }
   0x2   :  { %11 = vsyncpa [#allocation4], 0 }
   0x3   :  { %13 = vsyncpa [#allocation4 + $0x1], 0  ;;  %s682_s12 = smov 0   ;;  %s684_s13 = smov 0  }
   0x4   :  { %s686_s14 = smov 0   ;;  %s688_s15 = smov 0  }
   0x5 LB: > { %s703_s16 = sadd.s32 4294967295, %s655_s15   ;;  %s470_s17 = sadd.s32 4294967294, %s655_s15   ;;  %s655_s15 = sphi %s688_s15, %s871_s15   ;;  %s651_s14 = sphi %s686_s14, %s870_s14   ;;  %s647_s13 = sphi %s684_s13, %s869_s13   ;;  %s643_s12 = sphi %s682_s12, %s868_s12  }
   0x6   : > { %s707_s18 = sadd.s32 1, %s655_s15   ;;  %s26_s19 = sadd.s32 1, %s651_s14 }
   0x7   : > { %s23_s20 = ssub.s32 %s655_s15, %s707_s18  ;;  %p33_p0 = scmp.ne.s32.totalorder %s651_s14, %s647_s13 }
   0x8   : > { %p24_p1 = scmp.eq.s32.totalorder %s23_s20, 0  ;;  %p34_p2 = scmp.eq.s32.totalorder %s655_s15, 0 }
   0x9   : > { %p39_p3 = scmp.ne.s32.totalorder %s647_s13, %s643_s12  ;;  %p40_p4 = scmp.eq.s32.totalorder %s703_s16, 0 }
   0xa   : > { %s719_s21 = scalar_select %p24_p1, %s651_s14, %s26_s19  }
   0xb   : > { %p721_p5 = por %p34_p2, %p33_p0  ;;  %p725_p6 = por %p40_p4, %p39_p3 }
   0xc   : > { %p105_p7 = scmp.eq.s32.totalorder %s703_s16, 1  ;;  %p111_p8 = scmp.eq.s32.totalorder %s470_s17, 1 }
   0xd   : > { %p517_p10 = scmp.lt.s32.totalorder %s655_s15, 2  ;;  %s137_s26 = sand.u32 1, %s651_s14  }
   0xe   : > { %p732_p11 = por %p105_p7, %p33_p0  ;;  %p736_p12 = por %p111_p8, %p39_p3 }
   0xf   : > { %s489_s27 = sshll.u32 %s655_s15, 7  ;;  %s473_s28 = sshll.u32 %s137_s26, 3 }
  0x10   : > { %s860_s24 = scalar_select %p732_p11, 1, 0 }
  0x11   : > { %s861_s25 = scalar_select %p736_p12, 1, 0 }
  0x12   : > { %s745_s4 = scalar_lea.hbm %s853_s0, %s489_s27  ;;  %s141_s5 = scalar_lea.vmem [#allocation2], %s473_s28 }
  0x13   : > { %s149_s6 = sshll.u32 %s141_s5, 4  ;;  %p749_p13 = pnand %p517_p10, %p721_p5  ;;  %s753_s6 = int_to_ptr.vmem [resolvable:$true] %s149_s6 }
  0x14   : > { %s138_s8 = scalar_lea.sflag [#allocation3], %s137_s26  ;;  %s559_s9 = scalar_lea.hbm %s745_s4, 128 }
  0x15   : > { %p560_p2 = scmp.ne.s32.totalorder %s745_s4, %s559_s9  ;;  %p561_p3 = pneg %p749_p13 }
  0x16   : > { %s564_s17 = scalar_lea.hbm %s853_s0, 256  ;;  %p565_p5 = scmp.lt.u32.totalorder %s745_s4, %s853_s0 }
  0x17   : > { %p562_p4 = pnand %p561_p3, %p560_p2  ;;  %p566_p8 = scmp.lt.u32.totalorder %s564_s17, %s559_s9 }
  0x18   : > { %p568_p9 = scmp.lt.u32.totalorder %s559_s9, %s745_s4 }
  0x19   : > { %p563_p7 = pneg %p562_p4  ;;  %p567_p10 = por %p566_p8, %p565_p5 }
  0x1b   : > { %p569_p0 = por %p568_p9, %p567_p10 }
  0x1d   : > { %p570_p1 = pnand %p569_p0, %p563_p7 }
  0x1f   : > { %573 = shalt.err (!%p570_p1)
}
  0x20   : > { %s574_s22 = scalar_lea.vmem %s753_s6, 128  ;;  %s657_s26 = smov [#allocation2]  }
  0x21   : > { %p575_p2 = scmp.ne.s32.totalorder %s753_s6, %s574_s22  ;;  %s579_s27 = sshll.u32 %s657_s26, 4  ;;  %s580_s27 = int_to_ptr.vmem [resolvable:$false] %s579_s27 }
  0x22   : > { %s581_s28 = scalar_lea.vmem %s580_s27, 256  ;;  %p582_p11 = scmp.lt.s32.totalorder %s753_s6, %s580_s27 }
  0x23   : > { %p577_p4 = pnand %p575_p2, %p561_p3  ;;  %p583_p5 = scmp.lt.s32.totalorder %s581_s28, %s574_s22 }
  0x25   : > { %p578_p12 = pneg %p577_p4  ;;  %p584_p8 = por %p583_p5, %p582_p11 }
  0x27   : > { %p585_p9 = pnand %p584_p8, %p578_p12 }
  0x29   : > { %588 = shalt.err (!%p585_p9)
}
  0x2a   : > { %512 = dma.hbm_to_vmem [thread:$0]  (!%p749_p13), %s745_s4, 128, %s753_s6, %s138_s8  }
  0x2b   : > { %p863_p0 = scmp.lt.s32.totalorder %s655_s15, 3  ;;  %p864_p1 = scmp.ge.s32.totalorder %s655_s15, 1 }
  0x2d   : > { %p155_p3 = pnand %p864_p1, %p863_p0 }
  0x2e   : > { %s787_s29 = sand.u32 (!%p155_p3), 1, %s647_s13  }
  0x2f   : > { %158 = sbr.rel (%p155_p3) target bundleno = 794 (0x31a), region = 32  ;;  %s477_s30 = sshll.u32 (!%p155_p3), %s787_s29, 3 }
  0x30   : > { %s161_s5 = scalar_lea.sflag (!%p155_p3), [#allocation3], %s787_s29  ;;  %s164_s7 = scalar_lea.vmem (!%p155_p3), [#allocation2], %s477_s30 }
  0x36   : > { %634 = dma.done.wait (%p725_p6), %s161_s5, 128  }
  0x37   : > { %636 = vsyncadd (%p725_p6), %s161_s5, 4294967168  ;;  %vm191_vm0 = vcmask 1043456   ;;  %v187_v0 = vld [vmem:[%s164_s7] sm:$0xff]  ;;  %v658_v5 = vmov 0.0   ;;  %vm207_vm1 = vcmask 31744   ;;  %vm659_vm2 = vmmov 0  }
  0x38   : > { %v189_v1 = vcombine.high %v187_v0, %v187_v0  ;;  %v192_v2 = vsel %vm191_vm0, %v187_v0, 0.0  ;;  %495 = vmatprep.subr.mxu0 %v658_v5  ;;  %v198_v6 = vld [vmem:[%s854_s1] sm:$0x3]  ;;  %500 = vmatprep.subr.mxu1 %v658_v5  ;;  %v201_v7 = vlaneseq  ;;  %vm284_vm3 = vcmask 15360   ;;  %s490_s9 = sshll.u32 %s703_s16, 7  ;;  %s186_s10 = scalar_lea.vmem [#allocation5], %s477_s30 }
  0x39   : > { %496 = vmatpush3.xpose.msk.msra.mxu0 %vm207_vm1, %v198_v6  ;;  %497 = vmatprep.mubr.msk.f32.mxu0 %vm659_vm2, %v658_v5  ;;  %v199_v14 = vld [vmem:[%s855_s2] sm:$0xf]  ;;  %v660_v26 = vmov 839922192   ;;  %s400_s11 = sshll.u32 %s186_s10, 4  ;;  %s809_s20 = scalar_lea.hbm %s856_s3, %s490_s9  ;;  %s811_s11 = int_to_ptr.vmem [resolvable:$true] %s400_s11 }
  0x3a   : > { %v193_v3 = vsel %vm191_vm0, %v189_v1, 0.0  ;;  %502 = vmatprep.mubr.msk.f32.mxu1 %vm659_vm2, %v658_v5  ;;  %v202_v8 = vand.u32 127, %v201_v7  ;;  %v204_v9 = vshrl.u32 %v201_v7, 7  ;;  %501 = vmatpush3.xpose.msk.msra.mxu1 %vm284_vm3, %v199_v14  ;;  %v376_v27 = vunpack.c.l.s4 %v660_v26  ;;  %s386_s22 = scalar_lea.sflag [#allocation4], %s787_s29  ;;  %s589_s26 = scalar_lea.vmem %s811_s11, 128 }
  0x3b   : > { %v194_v4 = vadd.f32 %v193_v3, %v192_v2  ;;  %p590_p6 = scmp.ne.s32.totalorder %s811_s11, %s589_s26  ;;  %p865_p11 = scmp.ne.s32.totalorder %s860_s24, 0 }
  0x3c   : > { %v205_v10 = vsub.s32 %v202_v8, %v204_v9  ;;  %v369_v23 = vsub.s32 0, %v204_v9  ;;  %v377_v28 = vunpack.c.0.s8 %v376_v27  ;;  %s661_s16 = smov [#allocation5]  }
  0x3d   : > { %195 = vadd.xlane.f32.xlu0 %v194_v4  ;;  %p591_p12 = pnand %p590_p6, %p865_p11  ;;  %s593_s27 = sshll.u32 %s661_s16, 4  ;;  %s594_s27 = int_to_ptr.vmem [resolvable:$false] %s593_s27 }
  0x3e   : > { %v380_v29 = vsub.s32 %v377_v28, %v204_v9  ;;  %s595_s28 = scalar_lea.vmem %s594_s27, 256  ;;  %p596_p7 = scmp.lt.s32.totalorder %s811_s11, %s594_s27 }
  0x3f   : > { %p592_p13 = pneg %p591_p12  ;;  %p597_p10 = scmp.lt.s32.totalorder %s595_s28, %s589_s26 }
  0x41   : > { %p598_p2 = por %p597_p10, %p596_p7 }
  0x43   : > { %p599_p4 = pnand %p598_p2, %p592_p13 }
  0xca   : > { %v196_v11 = vpop.xlane.xlu0 %195 }
  0xcb   : > { %v197_v12 = vmul.f32 0.00390625, %v196_v11 }
  0xcd   : > { %v206_v13 = vrot.slane %v197_v12, %v205_v10 }
  0xcf   : > { %498 = vmatmul.mubr.msk.f32.vlgmr.msra.gmra.mrb[0].mxu0 %vm207_vm1, %v206_v13 }
 0x1a2   : > { %v279_v15 = vpop.f32.mrb[0].mxu0 }
 0x1a3   : > { %v283_v16 = vmax.f32 %v279_v15, 0.0  ;;  %v499_v17 = vpop.f32.mrb[1].mxu0 }
 0x1a5   : > { %503 = vmatmul.mubr.msk.f32.vlgmr.msra.gmra.mrb[0].mxu1 %vm284_vm3, %v283_v16 }
 0x278   : > { %v357_v18 = vpop.f32.mrb[0].mxu1 }
 0x279   : > { %v483_v19 = vmul.f32 -1.442695, %v357_v18  ;;  %v504_v20 = vpop.f32.mrb[1].mxu1 }
 0x27b   : > { %555 = vpow2.f32 %v483_v19 }
 0x285   : > { %v556_v21 = vpop.eup %555 }
 0x286   : > { %v364_v22 = vadd.f32 1.0, %v556_v21 }
 0x288   : > { %557 = vrcp.f32 %v364_v22 }
 0x292   : > { %v558_v24 = vpop.eup %557 }
 0x293   : > { %v370_v25 = vrot.slane %v558_v24, %v369_v23 }
 0x295   : > { %372 = vbcast.lane.b32.xlu0 %v370_v25, 256 }
 0x307   : > { %v373_v30 = vpop.permute.xlu0 %372 }
 0x308   : > { %v381_v31 = vrot.slane %v373_v30, %v380_v29 }
 0x30a   : > { %v383_v32 = vmul.f32 %v381_v31, %v187_v0 }
 0x30c   : > { %384 = vst [vmem:[%s186_s10] sm:$0xff] %v383_v32 }
 0x30d   : > { %602 = shalt.err (!%p599_p4)
}
 0x30e   : > { %s603_s29 = scalar_lea.hbm %s809_s20, 128  ;;  %s607_s7 = scalar_lea.hbm %s856_s3, 256 }
 0x30f   : > { %p604_p5 = scmp.ne.s32.totalorder %s809_s20, %s603_s29  ;;  %p608_p0 = scmp.lt.u32.totalorder %s809_s20, %s856_s3 }
 0x310   : > { %p609_p1 = scmp.lt.u32.totalorder %s607_s7, %s603_s29  ;;  %p611_p6 = scmp.lt.u32.totalorder %s603_s29, %s809_s20 }
 0x311   : > { %p605_p8 = pnand %p604_p5, %p865_p11 }
 0x312   : > { %p610_p3 = por %p609_p1, %p608_p0 }
 0x313   : > { %p606_p9 = pneg %p605_p8 }
 0x314   : > { %p612_p12 = por %p611_p6, %p610_p3 }
 0x316   : > { %p613_p13 = pnand %p612_p12, %p606_p9 }
 0x318   : > { %616 = shalt.err (!%p613_p13)
}
 0x319   : > { %507 = dma.vmem_to_hbm [thread:$0]  (%p865_p11), %s811_s11, 128, %s809_s20, %s386_s22  }
 0x31a PF: > { %s412_s23 = sand.u32 1, %s643_s12   ;;  %p866_p7 = scmp.ne.s32.totalorder %s861_s25, 0 }
 0x31b   : > { %p867_p10 = scmp.ge.s32.totalorder %s655_s15, 2  ;;  %s413_s8 = scalar_lea.sflag [#allocation4], %s412_s23 }
 0x31d   : > { %p514_p2 = pnand %p867_p10, %p866_p7 }
 0x31f   : > { %638 = dma.done.wait (!%p514_p2), %s413_s8, 128  }
 0x320   : > { %640 = vsyncadd (!%p514_p2), %s413_s8, 4294967168  ;;  %p16_p4 = scmp.ge.s32.totalorder %s707_s18, 4   ;;  %s868_s12 = smov %s647_s13 }
 0x321   : > { %s869_s13 = smov %s651_s14  ;;  %s870_s14 = smov %s719_s21 }
 0x322   : > { %s871_s15 = smov %s707_s18  ;;  %18 = sbr.rel (!%p16_p4) target bundleno = 5 (0x5), region = 77 }
 0x329   :  { %418 = vsyncpa [#allocation3], 1 }
 0x32a   :  { %420 = vsyncpa [#allocation3 + $0x1], 1 }
 0x32b   :  { %421 = vsyncpa [#allocation4], 1 }
 0x32c   :  { %423 = vsyncpa [#allocation4 + $0x1], 1 }

</bundles_post_ra>
